<compile_context>
chip_gen: v6e
topology: v6e:2x2x1
jax: 0.10.0
libtpu: 0.0.40
codegen_flags: <defaults>
</compile_context>

<pallas_src>
import math

import jax
import jax.numpy as jnp
from jax.experimental import pallas as pl
from jax.experimental.pallas import tpu as pltpu

_MAX_LANES = 4096          # cap on the lane-dense last dim (multiple of 128)
_TILE_BYTES_CACHE = [None]


def _round_up(n: int, m: int) -> int:
    return ((n + m - 1) // m) * m


def _sublane_gran(dtype) -> int:
    """Sublane packing granularity: 8 for 4-byte, 16 for 2-byte, 32 for 1-byte."""
    return max(8, 32 // jnp.dtype(dtype).itemsize)


def _tile_bytes() -> int:
    """Generation-tuned per-block tile size (bytes)."""
    if _TILE_BYTES_CACHE[0] is None:
        vmem = 128 << 20
        try:
            info = pltpu.get_tpu_info()
            vmem = int(getattr(info, "vmem_capacity_bytes", vmem))
        except Exception:
            pass
        # v7x: 64 MiB VMEM/TC, ~3.2 TB/s HBM -> 4 MiB tiles (16 MiB footprint).
        # v5e/v6e: 128 MiB VMEM, 16/32 MiB scoped default -> 2 MiB tiles (8 MiB).
        _TILE_BYTES_CACHE[0] = (4 << 20) if vmem <= (64 << 20) else (2 << 20)
    return _TILE_BYTES_CACHE[0]


def _pick_lanes(shape) -> int:
    """Smallest trailing-dim product that is a multiple of 128, capped at _MAX_LANES.

    Only called when the total element count is a multiple of 128, so the scan
    always terminates with a valid (128-multiple) value.
    """
    t = 1
    for d in reversed(shape):
        t *= int(d)
        if t % 128 == 0:
            break
    if t <= _MAX_LANES:
        return t
    lanes = _MAX_LANES
    while t % lanes != 0:
        lanes -= 128
    return lanes


def _make_shift_kernel(shift: float):
    def _kernel(x_ref, o_ref):
        # Elementwise shift: one vreg-wide VPU op per chunk of the tile.
        o_ref[...] = x_ref[...] + jnp.asarray(shift, dtype=o_ref.dtype)
    return _kernel


def _shift_pallas(x: jax.Array, shift: float) -> jax.Array:
    """Return x + shift via a tiled, lane-dense Pallas kernel (no padding copies)."""
    # Match PyTorch promotion: int tensor +/- 0.5 -> float; never truncate the shift.
    if not jnp.issubdtype(x.dtype, jnp.floating):
        x = x.astype(jnp.float32)

    orig_shape = x.shape
    dtype = x.dtype
    total = int(x.size)
    if total == 0:
        return x
    itemsize = jnp.dtype(dtype).itemsize
    gran = _sublane_gran(dtype)
    tile_bytes = _tile_bytes()

    cost = pl.CostEstimate(
        flops=total, transcendentals=0, bytes_accessed=2 * total * itemsize
    )
    params = pltpu.CompilerParams(dimension_semantics=("parallel",))

    if total % 128 == 0:
        # --- lane-dense 2-D path: (rows, lanes), lanes a multiple of 128, no pad.
        lanes = _pick_lanes(orig_shape)
        rows = total // lanes
        x2d = x.reshape(rows, lanes)

        max_tm = max(gran, (tile_bytes // (lanes * itemsize)) // gran * gran)
        if rows <= gran:
            tm = rows                                   # single full-height block
        elif rows <= max_tm:
            # Split into >= 2 blocks so both v7x TensorCores get work.
            tm = max(gran, _round_up(pl.cdiv(rows, 2), gran))
        else:
            tm = max_tm
        grid = (pl.cdiv(rows, tm),)

        y2d = pl.pallas_call(
            _make_shift_kernel(shift),
            out_shape=jax.ShapeDtypeStruct((rows, lanes), dtype),
            grid_spec=pltpu.PrefetchScalarGridSpec(
                num_scalar_prefetch=0,
                grid=grid,
                in_specs=[pl.BlockSpec((tm, lanes), lambda i: (i, 0))],
                out_specs=pl.BlockSpec((tm, lanes), lambda i: (i, 0)),
            ),
            compiler_params=params,
            cost_estimate=cost,
        )(x2d)
        return y2d.reshape(orig_shape)

    # --- 1-D fallback for totals not a multiple of 128: no padding; Pallas
    # masks the partial last block (out-of-range writes masked, reads unused
    # beyond the elementwise shift).
    flat = x.reshape(-1)
    block_elems = tile_bytes // itemsize                # multiple of 128
    block = total if total <= block_elems else block_elems
    grid = (pl.cdiv(total, block),)

    y = pl.pallas_call(
        _make_shift_kernel(shift),
        out_shape=jax.ShapeDtypeStruct((total,), dtype),
        grid_spec=pltpu.PrefetchScalarGridSpec(
            num_scalar_prefetch=0,
            grid=grid,
            in_specs=[pl.BlockSpec((block,), lambda i: (i,))],
            out_specs=pl.BlockSpec((block,), lambda i: (i,)),
        ),
        compiler_params=params,
        cost_estimate=cost,
    )(flat)
    return y.reshape(orig_shape)


def _per_sample_numel(shape) -> int:
    n = 1
    for d in shape[1:]:
        n *= int(d)
    return n


def preprocess_forward(x: jax.Array):
    """Preprocess.forward(x) -> (x - 0.5, logdet)."""
    y = _shift_pallas(x, -0.5)
    logdet = -math.log(256) * _per_sample_numel(x.shape)
    return y, logdet


def preprocess_inverse(x: jax.Array):
    """Preprocess.inverse(x) -> (x + 0.5, logdet)."""
    y = _shift_pallas(x, +0.5)
    logdet = math.log(256) * _per_sample_numel(x.shape)
    return y, logdet


if __name__ == "__main__":
    key = jax.random.PRNGKey(0)

    # 1) Small NCHW input consistent with the module's use on image-like tensors.
    x = jax.random.uniform(key, (2, 4, 16, 16), dtype=jnp.float32)
    y, logdet = preprocess_forward(x)
    y = jax.block_until_ready(y)
    assert jnp.allclose(y, x - 0.5, atol=1e-6), "forward output mismatch"
    assert abs(logdet - (-math.log(256) * (4 * 16 * 16))) < 1e-9, "forward logdet mismatch"

    z, logdet_inv = preprocess_inverse(y)
    z = jax.block_until_ready(z)
    assert jnp.allclose(z, x, atol=1e-6), "inverse output mismatch"
    assert abs(logdet_inv - math.log(256) * (4 * 16 * 16)) < 1e-9, "inverse logdet mismatch"

    # 2) Unaligned total (not a multiple of 128) -> 1-D masked-partial-block path.
    x_odd = jax.random.uniform(jax.random.PRNGKey(1), (2, 3, 17, 19), dtype=jnp.float32)
    y_odd, _ = preprocess_forward(x_odd)
    y_odd = jax.block_until_ready(y_odd)
    assert jnp.allclose(y_odd, x_odd - 0.5, atol=1e-6), "1-D path output mismatch"

    # 3) Larger aligned input -> multi-block 2-D path (>= 2 grid steps, "parallel").
    x_big = jax.random.uniform(jax.random.PRNGKey(2), (2, 8, 32, 128), dtype=jnp.float32)
    y_big, _ = preprocess_forward(x_big)
    y_big = jax.block_until_ready(y_big)
    assert jnp.allclose(y_big, x_big - 0.5, atol=1e-6), "multi-block path output mismatch"

    print("KERNEL_OK")
</pallas_src>

<mosaic_0001>
module attributes {stable_mosaic.version = 11 : i64} {
  func.func @_kernel(%arg0: i32, %arg1: memref<8x256xf32, #tpu.memory_space<vmem>>, %arg2: memref<8x256xf32, #tpu.memory_space<vmem>>) attributes {dimension_semantics = [#tpu.dimension_semantics<parallel>], iteration_bounds = array<i64: 1>, scalar_prefetch = 0 : i64, scratch_operands = 0 : i64, tpu.core_type = #tpu.core_type<tc>, window_params = [{transform_indices = @transform_0, window_bounds = array<i64: 8, 256>}, {transform_indices = @transform_1, window_bounds = array<i64: 8, 256>}]} {
    %c0 = arith.constant 0 : index
    %c0_0 = arith.constant 0 : index
    %0 = vector.load %arg1[%c0, %c0_0] : memref<8x256xf32, #tpu.memory_space<vmem>>, vector<8x256xf32>
    %cst = arith.constant -5.000000e-01 : f32
    %1 = vector.broadcast %cst : f32 to vector<8x256xf32>
    %2 = arith.addf %0, %1 : vector<8x256xf32>
    %c0_1 = arith.constant 0 : index
    %c0_2 = arith.constant 0 : index
    %3 = vector.load %arg2[%c0_1, %c0_2] : memref<8x256xf32, #tpu.memory_space<vmem>>, vector<8x256xf32>
    tpu.vector_store %arg2[%c0_1, %c0_2], %2 {strides = array<i32>} : memref<8x256xf32, #tpu.memory_space<vmem>>, vector<8x256xf32>,
    return
  }
  func.func @transform_0(%arg0: i32) -> (i32, i32) {
    %c0_i32 = arith.constant 0 : i32
    %c0_i32_0 = arith.constant 0 : i32
    return %arg0, %c0_i32 : i32, i32
  }
  func.func @transform_1(%arg0: i32) -> (i32, i32) {
    %c0_i32 = arith.constant 0 : i32
    %c0_i32_0 = arith.constant 0 : i32
    return %arg0, %c0_i32 : i32, i32
  }
}

</mosaic_0001>

<bundles_post_ra>
// kernel: tpu_custom_call.1
= control target key start
LH: loop header
LB: loop body
LE: loop exit
PB: predicated region body
PF: predicated region fallthrough
CT: control target
= control target key end

     0   :  { %6 = vsyncpa [#allocation3], 0  ;;  %s106_s0 = inlined_call_operand.hbm [shape: f32[8,256], index: 0, kind: input, shape index: {}]   ;;  %s107_s1 = inlined_call_operand.hbm [shape: f32[8,256], index: 1, kind: output, shape index: {}]  }
   0x1   :  { %7 = vsyncpa [#allocation4], 0  ;;  %s88_s6 = smov [#allocation2]  }
   0x2   :  { %s14_s7 = sshll.u32 %s88_s6, 4  ;;  %s15_s7 = int_to_ptr.vmem [resolvable:$true] %s14_s7 }
   0x3   :  { %s52_s8 = scalar_lea.vmem %s15_s7, 256  ;;  %p57_p1 = scmp.lt.s32.totalorder %s15_s7, %s15_s7 }
   0x4   :  { %p53_p0 = scmp.ne.s32.totalorder %s15_s7, %s52_s8  ;;  %p58_p2 = scmp.lt.s32.totalorder %s52_s8, %s52_s8 }
   0x6   :  { %p59_p3 = por %p58_p2, %p57_p1 }
   0x8   :  { %p60_p4 = pnand %p59_p3, %p53_p0 }
   0xa   :  { %63 = shalt.err (!%p60_p4)
}
   0xb   :  { %17 = dma.hbm_to_vmem [thread:$0]  %s106_s0, 256, %s15_s7, [#allocation3]  }
   0xc   :  { %84 = dma.done.wait [#allocation3], 256  }
   0xd   :  { %85 = vsyncadd [#allocation3], 4294967040  ;;  %s89_s11 = smov [#allocation5]   ;;  %v21_v0 = vld [vmem:[#allocation2] sm:$0xff]  ;;  %v22_v1 = vld [vmem:[#allocation2 + $0x8] sm:$0xff] }
   0xe   :  { %s33_s12 = sshll.u32 %s89_s11, 4  ;;  %v23_v2 = vadd.f32 -0.5, %v21_v0  ;;  %v24_v3 = vadd.f32 -0.5, %v22_v1  ;;  %s34_s12 = int_to_ptr.vmem [resolvable:$true] %s33_s12 }
   0xf   :  { %s64_s13 = scalar_lea.vmem %s34_s12, 256  ;;  %p69_p6 = scmp.lt.s32.totalorder %s34_s12, %s34_s12 }
  0x10   :  { %25 = vst [vmem:[#allocation5] sm:$0xff] %v23_v2  ;;  %26 = vst [vmem:[#allocation5 + $0x8] sm:$0xff] %v24_v3  ;;  %p65_p5 = scmp.ne.s32.totalorder %s34_s12, %s64_s13  ;;  %p70_p7 = scmp.lt.s32.totalorder %s64_s13, %s64_s13 }
  0x12   :  { %p71_p8 = por %p70_p7, %p69_p6 }
  0x14   :  { %p72_p9 = pnand %p71_p8, %p65_p5 }
  0x16   :  { %75 = shalt.err (!%p72_p9)
}
  0x17   :  { %36 = dma.vmem_to_hbm [thread:$0]  %s34_s12, 256, %s107_s1, [#allocation4]  }
  0x18   :  { %86 = dma.done.wait [#allocation4], 256  }
  0x19   :  { %87 = vsyncadd [#allocation4], 4294967040 }
  0x1a   :  { %40 = vsyncpa [#allocation3], 1 }
  0x1b   :  { %41 = vsyncpa [#allocation4], 1 }

</bundles_post_ra>
